<compile_context>
chip_gen: v5e
topology: v5e:2x2
jax: 0.10.0
libtpu: 0.0.40
codegen_flags: <defaults>
</compile_context>

<pallas_src>
import math
from typing import Dict, Tuple

import jax
import jax.numpy as jnp
from jax.experimental import pallas as pl
from jax.experimental.pallas import tpu as pltpu


_ONEHOT_MAX_VOCAB = 1024          # combined-vocab threshold for the fused kernel
_VMEM_BUDGET = 12 * 1024 * 1024   # conservative fit target (v5e: 16 MiB scoped default)


def _round_up(x: int, m: int) -> int:
    return ((x + m - 1) // m) * m


def _cdiv(a: int, b: int) -> int:
    return (a + b - 1) // b


def _multi_embedding_kernel(idx_ref, table_ref, out_ref):
    """idx_ref:   (TM, F) int32 indices, already offset into the combined vocab
       table_ref: (Vp, Dp) bf16 block-diagonal combined embedding table
       out_ref:   (TM, Dp) f32 concatenated embeddings (lane-dense, padded)"""
    tm, n_feat = idx_ref.shape
    vp = table_ref.shape[0]

    idx = idx_ref[...]                                        # (TM, F)
    iota = jax.lax.broadcasted_iota(jnp.int32, (tm, vp), 1)   # (TM, Vp)

    # Multi-hot: exactly one 1 per feature per row; vocab ranges are disjoint.
    # F is tiny and static, so the compare/OR chain stays short.
    hot = iota == idx[:, 0:1]
    for f in range(1, n_feat):
        hot = hot | (iota == idx[:, f : f + 1])
    multihot = hot.astype(jnp.bfloat16)                       # 0/1 exact in bf16

    # Block-diagonal contraction == per-feature row gather, pre-concatenated.
    out_ref[...] = jnp.dot(
        multihot, table_ref[...], preferred_element_type=jnp.float32
    )


def _vmem_accounting(tm: int, vp: int, dp: int, n_feat: int) -> int:
    table = 2 * vp * dp * 2        # bf16 table, conservatively counted double-buffered
    idx = 2 * tm * n_feat * 4      # int32 index block, double-buffered
    out = 2 * tm * dp * 4          # f32 output block, double-buffered
    mhot = 2 * tm * vp * 2         # bf16 multihot (+ bool-mask headroom)
    return table + idx + out + mhot


def _choose_tm(bs: int, vp: int, dp: int, n_feat: int) -> int:
    """Largest row tile (multiple of 8, <= 512) fitting the VMEM budget, capped so
    the grid has ~4+ steps when batch*seq allows (dual-TC / megacore sharding)."""
    tm = 8
    for cand in (512, 256, 128, 64, 32, 16, 8):
        if _vmem_accounting(cand, vp, dp, n_feat) <= _VMEM_BUDGET:
            tm = cand
            break
    bs8 = _round_up(max(bs, 8), 8)
    tm = min(tm, max(8, _round_up(_cdiv(bs8, 4), 8)))
    return tm


def _multi_embedding_lookup(
    idx_comb: jnp.ndarray, table: jnp.ndarray, sum_d: int
) -> jnp.ndarray:
    """idx_comb: (BS, F) int32 vocab-offset indices; table: (Vp, Dp) bf16.
    Returns (BS, sum_d) f32."""
    bs, n_feat = idx_comb.shape
    vp, dp = table.shape

    tm = _choose_tm(bs, vp, dp, n_feat)
    bs_pad = _round_up(max(bs, tm), tm)
    if bs_pad != bs:
        idx_comb = jnp.pad(idx_comb, ((0, bs_pad - bs), (0, 0)))
    grid = (bs_pad // tm,)

    vmem_limit = int(
        min(32 * 1024 * 1024,
            max(4 * 1024 * 1024, 2 * _vmem_accounting(tm, vp, dp, n_feat)))
    )

    out = pl.pallas_call(
        _multi_embedding_kernel,
        out_shape=jax.ShapeDtypeStruct((bs_pad, dp), jnp.float32),
        grid_spec=pltpu.PrefetchScalarGridSpec(
            num_scalar_prefetch=0,
            grid=grid,
            in_specs=[
                # (TM, F): F equals the full last dim, TM is a multiple of 8.
                pl.BlockSpec((tm, n_feat), lambda i: (i, 0)),
                # Combined table: same block every step -> stays resident.
                # (Single-buffering it via pipeline_mode=pl.Buffered(1) would
                # save one copy; the VMEM budget above already counts two, so
                # it is left at the default for lowering-compat safety.)
                pl.BlockSpec((vp, dp), lambda i: (0, 0)),
            ],
            # Lane-dense output block (Dp multiple of 128 -> unmasked vst).
            out_specs=pl.BlockSpec((tm, dp), lambda i: (i, 0)),
        ),
        compiler_params=pltpu.CompilerParams(
            dimension_semantics=("parallel",),
            vmem_limit_bytes=vmem_limit,
        ),
        cost_estimate=pl.CostEstimate(
            flops=2 * bs_pad * vp * dp,
            transcendentals=0,
            bytes_accessed=bs_pad * n_feat * 4 + vp * dp * 2 + bs_pad * dp * 4,
        ),
    )(idx_comb, table)

    # Slice only the dims that were actually padded (each slice costs an extra
    # HBM round trip in XLA).
    if bs_pad != bs:
        out = out[:bs]
    if dp != sum_d:
        out = out[:, :sum_d]
    return out


class MultiEmbedding:
    """JAX/Pallas port of etna MultiEmbedding (single fused forward kernel)."""

    def __init__(self, embedding_sizes: Dict[str, Tuple[int, int]]):
        self.embedding_sizes = embedding_sizes
        # Per-feature parameters, same shapes as nn.Embedding(n + 1, dim).
        self.tables: Dict[str, jnp.ndarray] = {}
        for i, (feature, (n, dim)) in enumerate(embedding_sizes.items()):
            key = jax.random.PRNGKey(1000 + i)
            self.tables[feature] = jax.random.normal(
                key, (n + 1, dim), dtype=jnp.float32
            )
        # Block-diagonal combined-table cache, keyed by feature order (the
        # torch module concatenates in x.keys() order).
        self._layout_cache = {}

    def _get_layout(self, feature_order):
        key = tuple(feature_order)
        if key in self._layout_cache:
            return self._layout_cache[key]

        voffs: Dict[str, int] = {}
        voff = doff = 0
        slots = []
        for f in feature_order:
            n, dim = self.embedding_sizes[f]
            voffs[f] = voff
            slots.append((f, voff, doff, n + 1, dim))
            voff += n + 1
            doff += dim
        sum_v, sum_d = voff, doff

        # Pad the combined vocab (contraction) dim and the concat dim to 128.
        vp = _round_up(max(sum_v, 128), 128)
        dp = _round_up(max(sum_d, 128), 128)
        table = jnp.zeros((vp, dp), dtype=jnp.float32)
        for f, vo, do, v, d in slots:
            table = table.at[vo : vo + v, do : do + d].set(self.tables[f])
        table = table.astype(jnp.bfloat16)  # bf16 contraction; 0/1 multihot is exact

        layout = (voffs, table, sum_v, sum_d)
        self._layout_cache[key] = layout
        return layout

    def __call__(self, x: Dict[str, jnp.ndarray]) -> jnp.ndarray:
        feature_order = list(x.keys())
        voffs, table, sum_v, sum_d = self._get_layout(feature_order)

        first = x[feature_order[0]]
        b, s, _ = first.shape

        if sum_v > _ONEHOT_MAX_VOCAB:
            # Large combined vocab: multihot/matmul scales O(Vp*Dp); a plain
            # row gather wins.
            # TODO(synk): replace with a Pallas DMA / Element-index row-gather
            # kernel; the XLA gather below is the correct fallback meanwhile.
            parts = [
                jnp.take(self.tables[f], x[f].astype(jnp.int32)[..., 0], axis=0)
                for f in feature_order
            ]
            return jnp.concatenate(parts, axis=2)

        bs = b * s
        cols = []
        for f in feature_order:
            idx_f = x[f].astype(jnp.int32).reshape(bs)  # squeeze(2) + flatten
            cols.append(idx_f + voffs[f])
        idx_comb = jnp.stack(cols, axis=1)              # (BS, F)

        out = _multi_embedding_lookup(idx_comb, table, sum_d)  # (BS, sum_D)
        return out.reshape(b, s, sum_d)


if __name__ == "__main__":
    # Small deterministic example.
    batch, seq = 2, 8
    embedding_sizes = {"cat_a": (5, 32), "cat_b": (10, 16)}

    key = jax.random.PRNGKey(0)
    x = {}
    for feature, (n, _dim) in embedding_sizes.items():
        key, sub = jax.random.split(key)
        # indices in [0, n] (nn.Embedding has n + 1 rows)
        x[feature] = jax.random.randint(
            sub, (batch, seq, 1), minval=0, maxval=n + 1, dtype=jnp.int32
        )

    model = MultiEmbedding(embedding_sizes)
    out = jax.block_until_ready(model(x))

    # Pure-JAX reference: gather against the bf16-quantized tables (the fused
    # kernel is exact w.r.t. the bf16 table entries since multihot is 0/1).
    ref_parts = []
    for feature in x.keys():
        idx = x[feature].astype(jnp.int32)[..., 0]  # (batch, seq)
        tbl = model.tables[feature].astype(jnp.bfloat16).astype(jnp.float32)
        ref_parts.append(jnp.take(tbl, idx, axis=0))
    ref = jnp.concatenate(ref_parts, axis=2)

    total_dim = sum(d for _, d in embedding_sizes.values())
    assert out.shape == (batch, seq, total_dim), out.shape
    assert out.dtype == jnp.float32
    assert jnp.allclose(out, ref, atol=1e-3, rtol=1e-3), float(
        jnp.max(jnp.abs(out - ref))
    )

    print("KERNEL_OK")
</pallas_src>

<mosaic_0001>
module attributes {stable_mosaic.version = 11 : i64} {
  func.func @_multi_embedding_kernel(%arg0: i32, %arg1: memref<8x2xi32, #tpu.memory_space<vmem>>, %arg2: memref<128x128xbf16, #tpu.memory_space<vmem>>, %arg3: memref<8x128xf32, #tpu.memory_space<vmem>>) attributes {dimension_semantics = [#tpu.dimension_semantics<parallel>], iteration_bounds = array<i64: 2>, scalar_prefetch = 0 : i64, scratch_operands = 0 : i64, tpu.core_type = #tpu.core_type<tc>, window_params = [{transform_indices = @transform_0, window_bounds = array<i64: 8, 2>}, {pipeline_mode = #tpu.pipeline_mode<synchronous>, transform_indices = @transform_1, window_bounds = array<i64: 128, 128>}, {transform_indices = @transform_2, window_bounds = array<i64: 8, 128>}]} {
    %c0 = arith.constant 0 : index
    %c0_0 = arith.constant 0 : index
    %0 = vector.load %arg1[%c0, %c0_0] : memref<8x2xi32, #tpu.memory_space<vmem>>, vector<8x2xi32>
    %1 = tpu.iota {dimensions = array<i32: 1>} : vector<8x128xi32>
    %2 = vector.extract_strided_slice %0 {offsets = [0, 0], sizes = [8, 1], strides = [1, 1]} : vector<8x2xi32> to vector<8x1xi32>
    %3 = vector.broadcast %2 : vector<8x1xi32> to vector<8x128xi32>
    %4 = arith.cmpi eq, %1, %3 : vector<8x128xi32>
    %5 = vector.extract_strided_slice %0 {offsets = [0, 1], sizes = [8, 1], strides = [1, 1]} : vector<8x2xi32> to vector<8x1xi32>
    %6 = vector.broadcast %5 : vector<8x1xi32> to vector<8x128xi32>
    %7 = arith.cmpi eq, %1, %6 : vector<8x128xi32>
    %8 = arith.ori %4, %7 : vector<8x128xi1>
    %9 = arith.extui %8 : vector<8x128xi1> to vector<8x128xi32>
    %10 = arith.sitofp %9 : vector<8x128xi32> to vector<8x128xf32>
    %11 = arith.truncf %10 : vector<8x128xf32> to vector<8x128xbf16>
    %c0_1 = arith.constant 0 : index
    %c0_2 = arith.constant 0 : index
    %12 = vector.load %arg2[%c0_1, %c0_2] : memref<128x128xbf16, #tpu.memory_space<vmem>>, vector<128x128xbf16>
    %cst = arith.constant dense<0.000000e+00> : vector<8x128xf32>
    %13 = tpu.matmul %11, %12, %cst {dimension_numbers = #tpu.dot_dimension_numbers<[1], [0], [0], [1], [0, 0, 1, 1], [], []>} : vector<8x128xbf16>, vector<128x128xbf16>, vector<8x128xf32> -> vector<8x128xf32>
    %c0_3 = arith.constant 0 : index
    %c0_4 = arith.constant 0 : index
    %14 = vector.load %arg3[%c0_3, %c0_4] : memref<8x128xf32, #tpu.memory_space<vmem>>, vector<8x128xf32>
    tpu.vector_store %arg3[%c0_3, %c0_4], %13 {strides = array<i32>} : memref<8x128xf32, #tpu.memory_space<vmem>>, vector<8x128xf32>,
    return
  }
  func.func @transform_0(%arg0: i32) -> (i32, i32) {
    %c0_i32 = arith.constant 0 : i32
    %c0_i32_0 = arith.constant 0 : i32
    return %arg0, %c0_i32 : i32, i32
  }
  func.func @transform_1(%arg0: i32) -> (i32, i32) {
    %c0_i32 = arith.constant 0 : i32
    %c0_i32_0 = arith.constant 0 : i32
    %c0_i32_1 = arith.constant 0 : i32
    return %c0_i32, %c0_i32_0 : i32, i32
  }
  func.func @transform_2(%arg0: i32) -> (i32, i32) {
    %c0_i32 = arith.constant 0 : i32
    %c0_i32_0 = arith.constant 0 : i32
    return %arg0, %c0_i32 : i32, i32
  }
}

</mosaic_0001>

<bundles_post_ra>
// kernel: tpu_custom_call.1
= control target key start
LH: loop header
LB: loop body
LE: loop exit
PB: predicated region body
PF: predicated region fallthrough
CT: control target
= control target key end

     0   :  { %7 = vsyncpa [#allocation3], 0  ;;  %s662_s0 = inlined_call_operand.vmem [shape: s32[16,2], index: 0, kind: input, shape index: {}]   ;;  %s663_s1 = inlined_call_operand.hbm [shape: bf16[128,128], index: 1, kind: input, shape index: {}]   ;;  %s664_s2 = inlined_call_operand.hbm [shape: f32[16,128], index: 2, kind: output, shape index: {}]  }
   0x1   :  { %8 = vsyncpa [#allocation4], 0 }
   0x2   :  { %10 = vsyncpa [#allocation4 + $0x1], 0  ;;  %s567_s9 = smov 0   ;;  %s569_s10 = smov 0  }
   0x3   :  { %s571_s11 = smov 0   ;;  %s573_s12 = smov 0  }
   0x4 LB: > { %s588_s13 = sadd.s32 4294967295, %s544_s12   ;;  %s336_s14 = sadd.s32 4294967294, %s544_s12   ;;  %s544_s12 = sphi %s573_s12, %s670_s12   ;;  %s540_s11 = sphi %s571_s11, %s669_s11   ;;  %s536_s10 = sphi %s569_s10, %s668_s10   ;;  %s532_s9 = sphi %s567_s9, %s667_s9  }
   0x5   : > { %s592_s15 = sadd.s32 1, %s544_s12   ;;  %s70_s16 = sadd.s32 1, %s540_s11 }
   0x6   : > { %s67_s17 = ssub.s32 %s544_s12, %s592_s15  ;;  %p80_p0 = scmp.ne.s32.totalorder %s540_s11, %s536_s10 }
   0x7   : > { %p68_p1 = scmp.eq.s32.totalorder %s67_s17, 0  ;;  %p81_p2 = scmp.eq.s32.totalorder %s588_s13, 1 }
   0x8   : > { %p86_p3 = scmp.ne.s32.totalorder %s536_s10, %s532_s9  ;;  %p87_p4 = scmp.eq.s32.totalorder %s336_s14, 1 }
   0x9   : > { %s603_s18 = scalar_select %p68_p1, %s540_s11, %s70_s16  }
   0xa   : > { %p605_p5 = por %p81_p2, %p80_p0  ;;  %p609_p6 = por %p87_p4, %p86_p3 }
   0xb   : > { %p337_p7 = scmp.ge.s32.totalorder %s544_s12, 1  ;;  %p94_p8 = scmp.lt.s32.totalorder %s544_s12, 3 }
   0xc   : > { %p405_p9 = scmp.eq.s32.totalorder %s588_s13, 0  ;;  %s105_s23 = sshll.u32 %s663_s1, 4  ;;  %s106_s23 = int_to_ptr.hbm [resolvable:$true] %s105_s23 }
   0xd   : > { %p95_p10 = pnand %p337_p7, %p94_p8  ;;  %s546_s24 = smov [#allocation2]  }
   0xe   : > { %s107_s25 = sshll.u32 %s546_s24, 4  ;;  %s547_s26 = smov 64   ;;  %s108_s25 = int_to_ptr.vmem [resolvable:$true] %s107_s25 }
   0xf   : > { %p397_p11 = pneg %p95_p10  ;;  %s548_s27 = smov 4  }
  0x10   : > { %130 = sbr.rel (%p95_p10) target bundleno = 290 (0x122), region = 28 }
  0x11   : > { %p398_p12 = pnand %p405_p9, %p397_p11 }
  0x13   : > { %400 = dma.hbm_to_vmem [thread:$0]  (!%p398_p12), %s106_s23, 1024, %s108_s25, [#allocation3], %s547_s26, %s547_s26, %s548_s27  }
  0x15   : > { %523 = dma.done.wait (%p405_p9), [#allocation3], 1024  }
  0x16   : > { %525 = vsyncadd (%p405_p9), [#allocation3], 4294966272  ;;  %p152_p13 = scmp.lt.s32.totalorder %s588_s13, 1  ;;  %v549_v0 = vmov 0   ;;  %v390_v2 = vld [vmem:[#allocation2 + $0x38] sm:$0xff]  ;;  %v389_v3 = vld [vmem:[#allocation2 + $0x30] sm:$0xff]  ;;  %v157_v12 = vlaneseq }
  0x17   : > { %446 = vset.pattern.permute.xlu0 %v549_v0  ;;  %235 = vmatpush.bf16.msra.mxu0 %v390_v2  ;;  %v388_v4 = vld [vmem:[#allocation2 + $0x28] sm:$0xff]  ;;  %v550_v5 = vmov 1   ;;  %v387_v6 = vld [vmem:[#allocation2 + $0x20] sm:$0xff]  ;;  %v386_v7 = vld [vmem:[#allocation2 + $0x18] sm:$0xff]  ;;  %v551_v15 = vmov 1.0|1.0  }
  0x18   : > { %s153_s28 = scalar_select %p152_p13, %s588_s13, 1  ;;  %v385_v8 = vld [vmem:[#allocation2 + $0x10] sm:$0xff]  ;;  %v384_v9 = vld [vmem:[#allocation2 + $0x8] sm:$0xff]  ;;  %v383_v10 = vld [vmem:[#allocation2] sm:$0xff]  ;;  %v158_v13 = vand.u32 127, %v157_v12 }
  0x19   : > { %s149_s5 = sand.u32 1, %s536_s10   ;;  %s380_s6 = sshll.u32 %s588_s13, 3 }
  0x1a   : > { %s343_s29 = sshll.u32 %s153_s28, 3  ;;  %s342_s7 = sshll.u32 %s149_s5, 3 }
  0x1b   : > { %s155_s4 = scalar_lea.vmem %s662_s0, %s343_s29  ;;  %236 = vmatpush.bf16.msra.mxu0 %v389_v3  ;;  %s260_s16 = scalar_lea.hbm %s664_s2, %s380_s6 }
  0x1c   : > { %v156_v1 = vld [vmem:[%s155_s4] sm:$0xff]  ;;  %s151_s17 = scalar_lea.vmem [#allocation5], %s342_s7  ;;  %s264_s22 = sshll.u32 %s260_s16, 4  ;;  %s265_s22 = int_to_ptr.hbm [resolvable:$true] %s264_s22 }
  0x1d   : > { %160 = vperm.xlu0 %446, %v156_v1   ;;  %s262_s21 = sshll.u32 %s151_s17, 4  ;;  %s250_s23 = scalar_lea.sflag [#allocation4], %s149_s5  ;;  %s263_s21 = int_to_ptr.vmem [resolvable:$true] %s262_s21 }
  0x1e   : > { %s492_s24 = sshra.s32 %s265_s22, 4  ;;  %s498_s27 = scalar_lea.hbm %s664_s2, 16  ;;  %s493_s24 = int_to_ptr.hbm [resolvable:$true] %s492_s24 }
  0x1f   : > { %237 = vmatpush.bf16.msra.mxu0 %v388_v4  ;;  %s494_s25 = scalar_lea.hbm %s493_s24, 8  ;;  %p499_p3 = scmp.lt.s32.totalorder %s493_s24, %s664_s2 }
  0x20   : > { %p495_p0 = scmp.ne.s32.totalorder %s493_s24, %s494_s25  ;;  %p500_p4 = scmp.lt.s32.totalorder %s498_s27, %s494_s25 }
  0x22   : > { %p496_p1 = pnand %p495_p0, %p605_p5  ;;  %p501_p7 = por %p500_p4, %p499_p3 }
  0x23   : > { %238 = vmatpush.bf16.msra.mxu0 %v387_v6 }
  0x24   : > { %p497_p2 = pneg %p496_p1 }
  0x25   : > { %447 = vset.pattern.permute.xlu0 %v550_v5 }
  0x26   : > { %164 = vperm.xlu0 %447, %v156_v1   ;;  %p502_p8 = pnand %p501_p7, %p497_p2 }
  0x27   : > { %239 = vmatpush.bf16.msra.mxu0 %v386_v7 }
  0x2b   : > { %240 = vmatpush.bf16.msra.mxu0 %v385_v8 }
  0x2f   : > { %241 = vmatpush.bf16.msra.mxu0 %v384_v9 }
  0x33   : > { %242 = vmatpush.bf16.msra.mxu0 %v383_v10 }
  0x8f   : > { %v161_v11 = vpop.permute.xlu0 %160 }
  0x90   : > { %vm162_vm0 = vcmp.eq.s32.totalorder %v158_v13, %v161_v11 }
  0x98   : > { %v165_v14 = vpop.permute.xlu0 %164 }
  0x99   : > { %vm166_vm1 = vcmp.eq.s32.totalorder %v158_v13, %v165_v14 }
  0x9a   : > { %vm167_vm2 = vmor %vm162_vm0, %vm166_vm1 }
  0x9b   : > { %vm377_vm3 = vmpackc.low %vm167_vm2, %vm167_vm2 }
  0x9c   : > { %378 = vmatmul.msk.bf16.vlgmr.msra.gmra.mxu0 %vm377_vm3, %v551_v15 }
 0x119   : > { %v244_v16 = vpop.f32.mrf.mxu0 }
 0x11a   : > { %248 = vst [vmem:[%s151_s17] sm:$0xff] %v244_v16 }
 0x11b   : > { %505 = shalt.err (!%p502_p8)
}
 0x11c   : > { %395 = dma.vmem_to_hbm [thread:$0]  (%p605_p5), %s263_s21, 128, %s265_s22, %s250_s23  }
 0x121   : > { %v246_v17 = vpop.f32.mrf.mxu0 }
 0x122 PF: > { %p407_p9 = scmp.ge.s32.totalorder %s544_s12, 2  ;;  %s276_s30 = sand.u32 1, %s532_s9  }
 0x123   : > { %s277_s3 = scalar_lea.sflag [#allocation4], %s276_s30 }
 0x124   : > { %p402_p10 = pnand %p407_p9, %p609_p6 }
 0x126   : > { %p403_p11 = pneg %p402_p10 }
 0x128   : > { %527 = dma.done.wait (%p403_p11), %s277_s3, 128  }
 0x129   : > { %529 = vsyncadd (%p403_p11), %s277_s3, 4294967168  ;;  %p13_p12 = scmp.ge.s32.totalorder %s592_s15, 4   ;;  %s667_s9 = smov %s536_s10 }
 0x12a   : > { %s668_s10 = smov %s540_s11  ;;  %s669_s11 = smov %s603_s18 }
 0x12b   : > { %s670_s12 = smov %s592_s15  ;;  %15 = sbr.rel (!%p13_p12) target bundleno = 4 (0x4), region = 68 }
 0x130   :  { %283 = vsyncpa [#allocation3], 1 }
 0x131   :  { %285 = vsyncpa [#allocation3 + $0x1], 1 }
 0x132   :  { %286 = vsyncpa [#allocation4], 1 }
 0x133   :  { %288 = vsyncpa [#allocation4 + $0x1], 1 }

</bundles_post_ra>
